<compile_context>
chip_gen: v7x
topology: tpu7x:2x2x1
jax: 0.10.0
libtpu: 0.0.40
codegen_flags: <defaults>
</compile_context>

<pallas_src>
import jax
import jax.numpy as jnp
from jax.experimental import pallas as pl
from jax.experimental.pallas import tpu as pltpu

IN_DIM, H1, H2, OUT_DIM = 1000, 256, 184, 153
H2_P = 256            # 184 padded to a lane multiple (hoisted, one-time)
TB_MAX = 1024         # max batch-tile rows


def _round_up(n, m):
    return ((n + m - 1) // m) * m


def mlp_kernel(x_ref, w1_ref, b1_ref, w2_ref, b2_ref, w3_ref, b3_ref, o_ref):
    # Cast (and implicit lane padding) of x happens here in VMEM — no HBM pad pass.
    x = x_ref[...].astype(jnp.bfloat16)
    # Layer 1: Linear(1000 -> 256)    (bf16 MXU matmul, f32 accumulate)
    h = jnp.dot(x, w1_ref[...], preferred_element_type=jnp.float32) + b1_ref[...]
    # Layer 2: Linear(256 -> 184) + ReLU   (184 padded to 256; pad cols stay 0)
    h = jnp.dot(h.astype(jnp.bfloat16), w2_ref[...],
                preferred_element_type=jnp.float32) + b2_ref[...]
    h = jnp.maximum(h, 0.0)
    # Layer 3: Linear(184 -> 153)     (pad rows of w3 are 0 -> contribute nothing)
    h = jnp.dot(h.astype(jnp.bfloat16), w3_ref[...],
                preferred_element_type=jnp.float32) + b3_ref[...]
    o_ref[...] = h.astype(o_ref.dtype)


def prepare_params(params):
    """One-time weight/bias cast + pad (hoisted out of the per-call path)."""
    w1, b1, w2, b2, w3, b3 = params
    w1p = w1.astype(jnp.bfloat16)                                         # (1000, 256)
    b1p = jnp.reshape(b1, (1, H1)).astype(jnp.float32)                    # (1, 256)
    w2p = jnp.zeros((H1, H2_P), jnp.bfloat16).at[:, :H2].set(
        w2.astype(jnp.bfloat16))                                          # (256, 256)
    b2p = jnp.zeros((1, H2_P), jnp.float32).at[:, :H2].set(
        jnp.reshape(b2, (1, H2)).astype(jnp.float32))                     # (1, 256)
    w3p = jnp.zeros((H2_P, OUT_DIM), jnp.bfloat16).at[:H2, :].set(
        w3.astype(jnp.bfloat16))                                          # (256, 153)
    b3p = jnp.reshape(b3, (1, OUT_DIM)).astype(jnp.float32)               # (1, 153)
    return (w1p, b1p, w2p, b2p, w3p, b3p)


def mlp_forward(x, prepared_params):
    """x: any shape with numel divisible by 1000 (mirrors xb.view(-1, 1000)).
    prepared_params: output of prepare_params()."""
    w1p, b1p, w2p, b2p, w3p, b3p = prepared_params

    x2d = jnp.reshape(x, (-1, IN_DIM))
    if x2d.dtype != jnp.bfloat16:
        # On v5e a bf16 caller-side stream is preferred; f32 is fine on v6e/v7x.
        x2d = x2d.astype(jnp.float32)
    B = x2d.shape[0]

    # Batch tiling: up to TB_MAX rows, 16-row granule (bf16 packs 16 rows per vreg),
    # and >= 2 grid steps whenever B > 16 so v7x's two TensorCores both get work.
    tb_target = min(TB_MAX, _round_up(B, 16))
    n_steps = max(pl.cdiv(B, tb_target), 2 if B > 16 else 1)
    TB = _round_up(pl.cdiv(B, n_steps), 16)
    B_pad = n_steps * TB
    if B_pad != B:
        x2d = jnp.pad(x2d, ((0, B_pad - B), (0, 0)))

    # Weights/biases: constant block index -> resident in VMEM across all grid steps.
    resident = lambda shape: pl.BlockSpec(shape, lambda i: (0, 0))

    flops = 2 * B_pad * (IN_DIM * H1 + H1 * H2 + H2 * OUT_DIM)
    bytes_accessed = (B_pad * IN_DIM * x2d.dtype.itemsize            # input stream
                      + 2 * (IN_DIM * H1 + H1 * H2_P + H2_P * OUT_DIM)  # bf16 weights
                      + 4 * (H1 + H2_P + OUT_DIM)                    # f32 biases
                      + 4 * B_pad * OUT_DIM)                         # f32 output

    out = pl.pallas_call(
        mlp_kernel,
        out_shape=jax.ShapeDtypeStruct((B_pad, OUT_DIM), jnp.float32),
        grid=(n_steps,),
        in_specs=[
            # Batch-tiled, pipelined input stream (last dim == full array dim).
            pl.BlockSpec((TB, IN_DIM), lambda i: (i, 0)),
            resident((IN_DIM, H1)), resident((1, H1)),
            resident((H1, H2_P)), resident((1, H2_P)),
            resident((H2_P, OUT_DIM)), resident((1, OUT_DIM)),
        ],
        out_specs=pl.BlockSpec((TB, OUT_DIM), lambda i: (i, 0)),
        compiler_params=pltpu.CompilerParams(
            dimension_semantics=("parallel",),   # shard batch tiles across v7x's 2 TCs
            vmem_limit_bytes=48 << 20,           # real need ~20 MiB at TB=1024
        ),
        cost_estimate=pl.CostEstimate(flops=flops, transcendentals=0,
                                      bytes_accessed=bytes_accessed),
    )(x2d, w1p, b1p, w2p, b2p, w3p, b3p)

    # Only strip batch padding (feature dim already written at its real width 153).
    return out if B_pad == B else out[:B]


def init_params(key):
    """Deterministic init mimicking nn.Linear's U(-1/sqrt(fan_in), +1/sqrt(fan_in))."""
    def linear(k, fan_in, fan_out):
        kw, kb = jax.random.split(k)
        bound = 1.0 / jnp.sqrt(jnp.float32(fan_in))
        # stored as (in, out) so the kernel does x @ W
        w = jax.random.uniform(kw, (fan_in, fan_out), jnp.float32, -bound, bound)
        b = jax.random.uniform(kb, (1, fan_out), jnp.float32, -bound, bound)
        return w, b

    k1, k2, k3 = jax.random.split(key, 3)
    w1, b1 = linear(k1, IN_DIM, H1)
    w2, b2 = linear(k2, H1, H2)
    w3, b3 = linear(k3, H2, OUT_DIM)
    return (w1, b1, w2, b2, w3, b3)


def mlp_reference(x, params):
    w1, b1, w2, b2, w3, b3 = params
    x2d = jnp.reshape(x, (-1, IN_DIM)).astype(jnp.float32)
    h = x2d @ w1 + b1
    h = h @ w2 + b2
    h = jnp.maximum(h, 0.0)
    return h @ w3 + b3


if __name__ == "__main__":
    key = jax.random.PRNGKey(0)
    kp, kx = jax.random.split(key)
    params = init_params(kp)
    prepped = prepare_params(params)   # one-time pad/cast, reused across calls

    # Small example input; numel per sample is 1000 (forward does view(-1, 1000)).
    x = jax.random.normal(kx, (2, 4, 250), dtype=jnp.float32)

    out = jax.block_until_ready(mlp_forward(x, prepped))
    ref = mlp_reference(x, params)

    assert out.shape == (2, OUT_DIM), out.shape
    # bf16 MXU inputs (f32 accumulation) -> looser tolerance than a pure-f32 kernel.
    assert jnp.allclose(out, ref, atol=3e-2, rtol=3e-2), "mismatch vs. reference"

    # TODO(synk): the train=False branch (Softmax + host-side numpy print) is inference-only
    # glue and is intentionally not part of the kernel (forward default is train=True).
    print("KERNEL_OK")
</pallas_src>

<mosaic_0001>
module attributes {stable_mosaic.version = 11 : i64} {
  func.func @mlp_kernel(%arg0: i32, %arg1: memref<16x1000xf32, #tpu.memory_space<vmem>>, %arg2: memref<1000x256xbf16, #tpu.memory_space<vmem>>, %arg3: memref<1x256xf32, #tpu.memory_space<vmem>>, %arg4: memref<256x256xbf16, #tpu.memory_space<vmem>>, %arg5: memref<1x256xf32, #tpu.memory_space<vmem>>, %arg6: memref<256x153xbf16, #tpu.memory_space<vmem>>, %arg7: memref<1x153xf32, #tpu.memory_space<vmem>>, %arg8: memref<16x153xf32, #tpu.memory_space<vmem>>) attributes {dimension_semantics = [#tpu.dimension_semantics<parallel>], iteration_bounds = array<i64: 1>, scalar_prefetch = 0 : i64, scratch_operands = 0 : i64, tpu.core_type = #tpu.core_type<tc>, window_params = [{transform_indices = @transform_0, window_bounds = array<i64: 16, 1000>}, {pipeline_mode = #tpu.pipeline_mode<synchronous>, transform_indices = @transform_1, window_bounds = array<i64: 1000, 256>}, {pipeline_mode = #tpu.pipeline_mode<synchronous>, transform_indices = @transform_2, window_bounds = array<i64: 1, 256>}, {pipeline_mode = #tpu.pipeline_mode<synchronous>, transform_indices = @transform_3, window_bounds = array<i64: 256, 256>}, {pipeline_mode = #tpu.pipeline_mode<synchronous>, transform_indices = @transform_4, window_bounds = array<i64: 1, 256>}, {pipeline_mode = #tpu.pipeline_mode<synchronous>, transform_indices = @transform_5, window_bounds = array<i64: 256, 153>}, {pipeline_mode = #tpu.pipeline_mode<synchronous>, transform_indices = @transform_6, window_bounds = array<i64: 1, 153>}, {transform_indices = @transform_7, window_bounds = array<i64: 16, 153>}]} {
    %c0 = arith.constant 0 : index
    %c0_0 = arith.constant 0 : index
    %0 = vector.load %arg1[%c0, %c0_0] : memref<16x1000xf32, #tpu.memory_space<vmem>>, vector<16x1000xf32>
    %1 = arith.truncf %0 : vector<16x1000xf32> to vector<16x1000xbf16>
    %c0_1 = arith.constant 0 : index
    %c0_2 = arith.constant 0 : index
    %2 = vector.load %arg2[%c0_1, %c0_2] : memref<1000x256xbf16, #tpu.memory_space<vmem>>, vector<1000x256xbf16>
    %cst = arith.constant dense<0.000000e+00> : vector<16x256xf32>
    %3 = tpu.matmul %1, %2, %cst {dimension_numbers = #tpu.dot_dimension_numbers<[1], [0], [0], [1], [0, 0, 1, 1], [], []>} : vector<16x1000xbf16>, vector<1000x256xbf16>, vector<16x256xf32> -> vector<16x256xf32>
    %c0_3 = arith.constant 0 : index
    %c0_4 = arith.constant 0 : index
    %4 = vector.load %arg3[%c0_3, %c0_4] : memref<1x256xf32, #tpu.memory_space<vmem>>, vector<1x256xf32>
    %5 = vector.broadcast %4 : vector<1x256xf32> to vector<16x256xf32>
    %6 = arith.addf %3, %5 : vector<16x256xf32>
    %7 = arith.truncf %6 : vector<16x256xf32> to vector<16x256xbf16>
    %c0_5 = arith.constant 0 : index
    %c0_6 = arith.constant 0 : index
    %8 = vector.load %arg4[%c0_5, %c0_6] : memref<256x256xbf16, #tpu.memory_space<vmem>>, vector<256x256xbf16>
    %cst_7 = arith.constant dense<0.000000e+00> : vector<16x256xf32>
    %9 = tpu.matmul %7, %8, %cst_7 {dimension_numbers = #tpu.dot_dimension_numbers<[1], [0], [0], [1], [0, 0, 1, 1], [], []>} : vector<16x256xbf16>, vector<256x256xbf16>, vector<16x256xf32> -> vector<16x256xf32>
    %c0_8 = arith.constant 0 : index
    %c0_9 = arith.constant 0 : index
    %10 = vector.load %arg5[%c0_8, %c0_9] : memref<1x256xf32, #tpu.memory_space<vmem>>, vector<1x256xf32>
    %11 = vector.broadcast %10 : vector<1x256xf32> to vector<16x256xf32>
    %12 = arith.addf %9, %11 : vector<16x256xf32>
    %cst_10 = arith.constant 0.000000e+00 : f32
    %13 = vector.broadcast %cst_10 : f32 to vector<16x256xf32>
    %14 = arith.maximumf %12, %13 : vector<16x256xf32>
    %15 = arith.truncf %14 : vector<16x256xf32> to vector<16x256xbf16>
    %c0_11 = arith.constant 0 : index
    %c0_12 = arith.constant 0 : index
    %16 = vector.load %arg6[%c0_11, %c0_12] : memref<256x153xbf16, #tpu.memory_space<vmem>>, vector<256x153xbf16>
    %cst_13 = arith.constant dense<0.000000e+00> : vector<16x153xf32>
    %17 = tpu.matmul %15, %16, %cst_13 {dimension_numbers = #tpu.dot_dimension_numbers<[1], [0], [0], [1], [0, 0, 1, 1], [], []>} : vector<16x256xbf16>, vector<256x153xbf16>, vector<16x153xf32> -> vector<16x153xf32>
    %c0_14 = arith.constant 0 : index
    %c0_15 = arith.constant 0 : index
    %18 = vector.load %arg7[%c0_14, %c0_15] : memref<1x153xf32, #tpu.memory_space<vmem>>, vector<1x153xf32>
    %19 = vector.broadcast %18 : vector<1x153xf32> to vector<16x153xf32>
    %20 = arith.addf %17, %19 : vector<16x153xf32>
    %c0_16 = arith.constant 0 : index
    %c0_17 = arith.constant 0 : index
    %21 = vector.load %arg8[%c0_16, %c0_17] : memref<16x153xf32, #tpu.memory_space<vmem>>, vector<16x153xf32>
    tpu.vector_store %arg8[%c0_16, %c0_17], %20 {strides = array<i32>} : memref<16x153xf32, #tpu.memory_space<vmem>>, vector<16x153xf32>,
    return
  }
  func.func @transform_0(%arg0: i32) -> (i32, i32) {
    %c0_i32 = arith.constant 0 : i32
    %c0_i32_0 = arith.constant 0 : i32
    return %arg0, %c0_i32 : i32, i32
  }
  func.func @transform_1(%arg0: i32) -> (i32, i32) {
    %c0_i32 = arith.constant 0 : i32
    %c0_i32_0 = arith.constant 0 : i32
    %c0_i32_1 = arith.constant 0 : i32
    return %c0_i32, %c0_i32_0 : i32, i32
  }
  func.func @transform_2(%arg0: i32) -> (i32, i32) {
    %c0_i32 = arith.constant 0 : i32
    %c0_i32_0 = arith.constant 0 : i32
    %c0_i32_1 = arith.constant 0 : i32
    return %c0_i32, %c0_i32_0 : i32, i32
  }
  func.func @transform_3(%arg0: i32) -> (i32, i32) {
    %c0_i32 = arith.constant 0 : i32
    %c0_i32_0 = arith.constant 0 : i32
    %c0_i32_1 = arith.constant 0 : i32
    return %c0_i32, %c0_i32_0 : i32, i32
  }
  func.func @transform_4(%arg0: i32) -> (i32, i32) {
    %c0_i32 = arith.constant 0 : i32
    %c0_i32_0 = arith.constant 0 : i32
    %c0_i32_1 = arith.constant 0 : i32
    return %c0_i32, %c0_i32_0 : i32, i32
  }
  func.func @transform_5(%arg0: i32) -> (i32, i32) {
    %c0_i32 = arith.constant 0 : i32
    %c0_i32_0 = arith.constant 0 : i32
    %c0_i32_1 = arith.constant 0 : i32
    return %c0_i32, %c0_i32_0 : i32, i32
  }
  func.func @transform_6(%arg0: i32) -> (i32, i32) {
    %c0_i32 = arith.constant 0 : i32
    %c0_i32_0 = arith.constant 0 : i32
    %c0_i32_1 = arith.constant 0 : i32
    return %c0_i32, %c0_i32_0 : i32, i32
  }
  func.func @transform_7(%arg0: i32) -> (i32, i32) {
    %c0_i32 = arith.constant 0 : i32
    %c0_i32_0 = arith.constant 0 : i32
    return %arg0, %c0_i32 : i32, i32
  }
}

</mosaic_0001>

<bundles_post_ra>
// kernel: tpu_custom_call.1
= control target key start
LH: loop header
LB: loop body
LE: loop exit
PB: predicated region body
PF: predicated region fallthrough
CT: control target
= control target key end

     0   :  { %12 = vsyncpa [#allocation3], 0  ;;  %s2410_s0 = inlined_call_operand.vmem [shape: f32[16,1000], index: 0, kind: input, shape index: {}]   ;;  %s2411_s1 = inlined_call_operand.hbm [shape: bf16[1000,256], index: 1, kind: input, shape index: {}]   ;;  %s2412_s2 = inlined_call_operand.vmem [shape: f32[1,256], index: 2, kind: input, shape index: {}]   ;;  %s2413_s3 = inlined_call_operand.vmem [shape: bf16[256,256], index: 3, kind: input, shape index: {}]   ;;  %s2414_s4 = inlined_call_operand.vmem [shape: f32[1,256], index: 4, kind: input, shape index: {}]   ;;  %s2415_s5 = inlined_call_operand.vmem [shape: bf16[256,153], index: 5, kind: input, shape index: {}]   ;;  %s2416_s6 = inlined_call_operand.vmem [shape: f32[1,153], index: 6, kind: input, shape index: {}]   ;;  %s2417_s7 = inlined_call_operand.hbm [shape: f32[16,153], index: 7, kind: output, shape index: {}]  }
   0x1   :  { %13 = vsyncpa [#allocation4], 0  ;;  %s2081_s24 = smov [#allocation2]   ;;  %s2033_s28 = scalar_lea.hbm %s2411_s1, 16000 }
   0x2   :  { %s21_s25 = sshll.u32 %s2081_s24, 4  ;;  %p2034_p0 = scmp.ne.s32.totalorder %s2411_s1, %s2033_s28  ;;  %s22_s25 = int_to_ptr.vmem [resolvable:$true] %s21_s25 }
   0x3   :  { %p2037_p1 = scmp.lt.u32.totalorder %s2033_s28, %s2411_s1 }
   0x5   :  { %p2039_p2 = pnand %p2037_p1, %p2034_p0 }
   0x7   :  { %2042 = shalt.err (!%p2039_p2)
}
   0x8   :  { %s2043_s10 = scalar_lea.vmem %s22_s25, 16000  ;;  %p2048_p4 = scmp.lt.s32.totalorder %s22_s25, %s22_s25 }
   0x9   :  { %p2044_p3 = scmp.ne.s32.totalorder %s22_s25, %s2043_s10  ;;  %p2049_p5 = scmp.lt.s32.totalorder %s2043_s10, %s2043_s10 }
   0xb   :  { %p2050_p6 = por %p2049_p5, %p2048_p4 }
   0xd   :  { %p2051_p7 = pnand %p2050_p6, %p2044_p3 }
   0xf   :  { %2054 = shalt.err (!%p2051_p7)
}
  0x10   :  { %s2082_s11 = smov 128   ;;  %s2083_s12 = smov 8  }
  0x11   :  { %27 = dma.hbm_to_vmem [thread:$0]  %s2411_s1, 16000, %s22_s25, [#allocation3], %s2082_s11, %s2082_s11, %s2083_s12  }
  0x12   :  { %2077 = dma.done.wait [#allocation3], 16000  }
  0x13   :  { %2078 = vsyncadd [#allocation3], 4294951296  ;;  %v1749_v0 = vld [vmem:[#allocation2 + $0x104] ss:$8 sps:$4 sm:$0xff]   ;;  %v1751_v1 = vld [vmem:[#allocation2 + $0x100] ss:$8 sps:$4 sm:$0xff]  }
  0x14   :  { %882 = vmatprep.subr.bf16.mxu0 %v1749_v0  ;;  %v1752_v2 = vld [vmem:[#allocation2 + $0x114] ss:$8 sps:$4 sm:$0xff]   ;;  %v1754_v3 = vld [vmem:[#allocation2 + $0x110] ss:$8 sps:$4 sm:$0xff]   ;;  %v1755_v4 = vld [vmem:[#allocation2 + $0x124] ss:$8 sps:$4 sm:$0xff]  }
  0x15   :  { %883 = vmatpush1.bf16.msra.mxu0 %v1751_v1  ;;  %v1757_v5 = vld [vmem:[#allocation2 + $0x120] ss:$8 sps:$4 sm:$0xff]   ;;  %v1758_v6 = vld [vmem:[#allocation2 + $0x134] ss:$8 sps:$4 sm:$0xff]   ;;  %v1760_v7 = vld [vmem:[#allocation2 + $0x130] ss:$8 sps:$4 sm:$0xff]  }
  0x16   :  { %884 = vmatprep.subr.bf16.mxu0 %v1752_v2  ;;  %v1761_v8 = vld [vmem:[#allocation2 + $0x144] ss:$8 sps:$4 sm:$0xff]   ;;  %v1763_v9 = vld [vmem:[#allocation2 + $0x140] ss:$8 sps:$4 sm:$0xff]   ;;  %v1764_v10 = vld [vmem:[#allocation2 + $0x154] ss:$8 sps:$4 sm:$0xff]  }
  0x17   :  { %v1766_v11 = vld [vmem:[#allocation2 + $0x150] ss:$8 sps:$4 sm:$0xff]   ;;  %v1767_v12 = vld [vmem:[#allocation2 + $0x164] ss:$8 sps:$4 sm:$0xff]   ;;  %v1769_v16 = vld [vmem:[#allocation2 + $0x160] ss:$8 sps:$4 sm:$0xff]  }
  0x18   :  { %v45_v13 = vld [vmem:[%s2410_s0 + $0x18] sm:$0xff]  ;;  %v1773_v19 = vld [vmem:[#allocation2 + $0x184] ss:$8 sps:$4 sm:$0xff]   ;;  %v1775_v20 = vld [vmem:[#allocation2 + $0x180] ss:$8 sps:$4 sm:$0xff]   ;;  %vm828_vm0 = vcmask 850944  }
  0x19   :  { %885 = vmatpush1.bf16.msra.mxu0 %v1754_v3  ;;  %v53_v14 = vld [vmem:[%s2410_s0 + $0x58] sm:$0xff]  ;;  %v1779_v23 = vld [vmem:[#allocation2 + $0x1a4] ss:$8 sps:$4 sm:$0xff]   ;;  %v1781_v24 = vld [vmem:[#allocation2 + $0x1a0] ss:$8 sps:$4 sm:$0xff]   ;;  %vm832_vm1 = vcmask 1043456  }
  0x1a   :  { %886 = vmatprep.subr.bf16.mxu0 %v1755_v4  ;;  %v61_v15 = vpack.c.bf16 %v53_v14, %v45_v13  ;;  %v1770_v17 = vld [vmem:[#allocation2 + $0x174] ss:$8 sps:$4 sm:$0xff]   ;;  %v1772_v18 = vld [vmem:[#allocation2 + $0x170] ss:$8 sps:$4 sm:$0xff]   ;;  %v1839_v26 = vld [vmem:[#allocation2 + $0x4] ss:$8 sps:$4 sm:$0xff]  }
  0x1b   :  { %v1776_v21 = vld [vmem:[#allocation2 + $0x194] ss:$8 sps:$4 sm:$0xff]   ;;  %v1778_v22 = vld [vmem:[#allocation2 + $0x190] ss:$8 sps:$4 sm:$0xff]   ;;  %v1841_v27 = vld [vmem:[#allocation2] ss:$8 sps:$4 sm:$0xff]   ;;  %839 = vmatprep.subr.bf16.mxu1 %v1839_v26 }
  0x1c   :  { %914 = vmatprep.mubr.bf16.mxu0 %v61_v15  ;;  %v1782_v25 = vld [vmem:[#allocation2 + $0x1b4] ss:$8 sps:$4 sm:$0xff]   ;;  %v1784_v28 = vld [vmem:[#allocation2 + $0x1b0] ss:$8 sps:$4 sm:$0xff]   ;;  %v1785_v29 = vld [vmem:[#allocation2 + $0x1c4] ss:$8 sps:$4 sm:$0xff]   ;;  %840 = vmatpush1.bf16.msra.mxu1 %v1841_v27 }
  0x1d   :  { %887 = vmatpush1.bf16.msra.mxu0 %v1757_v5  ;;  %v1845_v30 = vld [vmem:[#allocation2 + $0x14] ss:$8 sps:$4 sm:$0xff]   ;;  %v1847_v31 = vld [vmem:[#allocation2 + $0x10] ss:$8 sps:$4 sm:$0xff]   ;;  %v1787_v32 = vld [vmem:[#allocation2 + $0x1c0] ss:$8 sps:$4 sm:$0xff]  }
  0x1e   :  { %888 = vmatprep.subr.bf16.mxu0 %v1758_v6  ;;  %841 = vmatprep.subr.bf16.mxu1 %v1845_v30  ;;  %v1851_v33 = vld [vmem:[#allocation2 + $0x24] ss:$8 sps:$4 sm:$0xff]   ;;  %v1788_v34 = vld [vmem:[#allocation2 + $0x1d4] ss:$8 sps:$4 sm:$0xff]   ;;  %v1853_v35 = vld [vmem:[#allocation2 + $0x20] ss:$8 sps:$4 sm:$0xff]  }
  0x1f   :  { %v1790_v36 = vld [vmem:[#allocation2 + $0x1d0] ss:$8 sps:$4 sm:$0xff]   ;;  %v1857_v37 = vld [vmem:[#allocation2 + $0x34] ss:$8 sps:$4 sm:$0xff]   ;;  %v1791_v38 = vld [vmem:[#allocation2 + $0x1e4] ss:$8 sps:$4 sm:$0xff]  }
  0x20   :  { %842 = vmatpush1.bf16.msra.mxu1 %v1847_v31  ;;  %v1859_v39 = vld [vmem:[#allocation2 + $0x30] ss:$8 sps:$4 sm:$0xff]   ;;  %v1863_v40 = vld [vmem:[#allocation2 + $0x44] ss:$8 sps:$4 sm:$0xff]   ;;  %v1793_v41 = vld [vmem:[#allocation2 + $0x1e0] ss:$8 sps:$4 sm:$0xff]  }
  0x21   :  { %889 = vmatpush1.bf16.msra.mxu0 %v1760_v7  ;;  %843 = vmatprep.subr.bf16.mxu1 %v1851_v33  ;;  %v1794_v42 = vld [vmem:[#allocation2 + $0x1f4] ss:$8 sps:$4 sm:$0xff]   ;;  %v1796_v43 = vld [vmem:[#allocation2 + $0x1f0] ss:$8 sps:$4 sm:$0xff]   ;;  %v1865_v44 = vld [vmem:[#allocation2 + $0x40] ss:$8 sps:$4 sm:$0xff]  }
  0x22   :  { %890 = vmatprep.subr.bf16.mxu0 %v1761_v8  ;;  %v1799_v45 = vld [vmem:[#allocation2 + $0x204] ss:$8 sps:$4 sm:$0xff]   ;;  %v44_v46 = vld [vmem:[%s2410_s0 + $0x10] sm:$0xff]  ;;  %v1797_v54 = vld [vmem:[#allocation2 + $0x200] ss:$8 sps:$4 sm:$0xff]   ;;  %s2084_s25 = smov [#allocation5]  }
  0x23   :  { %v1869_v47 = vld [vmem:[#allocation2 + $0x54] ss:$8 sps:$4 sm:$0xff]   ;;  %v47_v49 = vld [vmem:[%s2410_s0 + $0x28] sm:$0xff]  ;;  %v1871_v51 = vld [vmem:[#allocation2 + $0x50] ss:$8 sps:$4 sm:$0xff]   ;;  %s1523_s26 = sshll.u32 %s2084_s25, 4  ;;  %s1524_s26 = int_to_ptr.vmem [resolvable:$true] %s1523_s26 }
  0x24   :  { %844 = vmatpush1.bf16.msra.mxu1 %v1853_v35  ;;  %v52_v48 = vld [vmem:[%s2410_s0 + $0x50] sm:$0xff]  ;;  %v55_v50 = vld [vmem:[%s2410_s0 + $0x68] sm:$0xff]  ;;  %v42_v33 = vld [vmem:[%s2410_s0] sm:$0xff]  ;;  %vm1514_vm2 = vcmask 203776   ;;  %p2060_p9 = scmp.lt.s32.totalorder %s1524_s26, %s1524_s26 }
  0x25   :  { %891 = vmatpush1.bf16.msra.mxu0 %v1763_v9  ;;  %845 = vmatprep.subr.bf16.mxu1 %v1857_v37  ;;  %v60_v52 = vpack.c.bf16 %v52_v48, %v44_v46  ;;  %v1875_v53 = vld [vmem:[#allocation2 + $0x64] ss:$8 sps:$4 sm:$0xff]   ;;  %v63_v55 = vpack.c.bf16 %v55_v50, %v47_v49  ;;  %v1802_v56 = vld [vmem:[#allocation2 + $0x214] ss:$8 sps:$4 sm:$0xff]   ;;  %v1877_v57 = vld [vmem:[#allocation2 + $0x60] ss:$8 sps:$4 sm:$0xff]  }
  0x26   :  { %892 = vmatprep.subr.bf16.mxu0 %v1764_v10  ;;  %v1881_v58 = vld [vmem:[#allocation2 + $0x74] ss:$8 sps:$4 sm:$0xff]   ;;  %v1800_v59 = vld [vmem:[#allocation2 + $0x210] ss:$8 sps:$4 sm:$0xff]   ;;  %v1805_v60 = vld [vmem:[#allocation2 + $0x224] ss:$8 sps:$4 sm:$0xff]  }
  0x27   :  { %v1883_v61 = vld [vmem:[#allocation2 + $0x70] ss:$8 sps:$4 sm:$0xff]   ;;  %v1887_v62 = vld [vmem:[#allocation2 + $0x84] ss:$8 sps:$4 sm:$0xff]   ;;  %v1803_v63 = vld [vmem:[#allocation2 + $0x220] ss:$8 sps:$4 sm:$0xff]  }
  0x28   :  { %846 = vmatpush1.bf16.msra.mxu1 %v1859_v39  ;;  %v1808_v0 = vld [vmem:[#allocation2 + $0x234] ss:$8 sps:$4 sm:$0xff]   ;;  %v1889_v1 = vld [vmem:[#allocation2 + $0x80] ss:$8 sps:$4 sm:$0xff]   ;;  %v1806_v3 = vld [vmem:[#allocation2 + $0x230] ss:$8 sps:$4 sm:$0xff]  }
  0x29   :  { %893 = vmatpush1.bf16.msra.mxu0 %v1766_v11  ;;  %847 = vmatprep.subr.bf16.mxu1 %v1863_v40  ;;  %v1893_v2 = vld [vmem:[#allocation2 + $0x94] ss:$8 sps:$4 sm:$0xff]   ;;  %v1811_v4 = vld [vmem:[#allocation2 + $0x244] ss:$8 sps:$4 sm:$0xff]   ;;  %v1895_v5 = vld [vmem:[#allocation2 + $0x90] ss:$8 sps:$4 sm:$0xff]  }
  0x2a   :  { %894 = vmatprep.subr.bf16.mxu0 %v1767_v12  ;;  %v1899_v6 = vld [vmem:[#allocation2 + $0xa4] ss:$8 sps:$4 sm:$0xff]   ;;  %v1809_v7 = vld [vmem:[#allocation2 + $0x240] ss:$8 sps:$4 sm:$0xff]   ;;  %v1814_v8 = vld [vmem:[#allocation2 + $0x254] ss:$8 sps:$4 sm:$0xff]  }
  0x2b   :  { %v1901_v9 = vld [vmem:[#allocation2 + $0xa0] ss:$8 sps:$4 sm:$0xff]   ;;  %v1905_v10 = vld [vmem:[#allocation2 + $0xb4] ss:$8 sps:$4 sm:$0xff]   ;;  %v1812_v11 = vld [vmem:[#allocation2 + $0x250] ss:$8 sps:$4 sm:$0xff]  }
  0x2c   :  { %848 = vmatpush1.bf16.msra.mxu1 %v1865_v44  ;;  %v1817_v12 = vld [vmem:[#allocation2 + $0x264] ss:$8 sps:$4 sm:$0xff]   ;;  %v1907_v13 = vld [vmem:[#allocation2 + $0xb0] ss:$8 sps:$4 sm:$0xff]   ;;  %v1821_v26 = vld [vmem:[#allocation2 + $0x280] ss:$8 sps:$4 sm:$0xff]  }
  0x2d   :  { %895 = vmatpush1.bf16.msra.mxu0 %v1769_v16  ;;  %849 = vmatprep.subr.bf16.mxu1 %v1869_v47  ;;  %v43_v14 = vld [vmem:[%s2410_s0 + $0x8] sm:$0xff]  ;;  %v1826_v27 = vld [vmem:[#allocation2 + $0x294] ss:$8 sps:$4 sm:$0xff]   ;;  %v1830_v39 = vld [vmem:[#allocation2 + $0x2b0] ss:$8 sps:$4 sm:$0xff]  }
  0x2e   :  { %896 = vmatprep.subr.bf16.mxu0 %v1770_v17  ;;  %v51_v15 = vld [vmem:[%s2410_s0 + $0x48] sm:$0xff]  ;;  %v1929_v30 = vld [vmem:[#allocation2 + $0xf4] ss:$8 sps:$4 sm:$0xff]   ;;  %v1836_v49 = vld [vmem:[#allocation2 + $0x2d0] ss:$8 sps:$4 sm:$0xff]  }
  0x2f   :  { %v1911_v16 = vld [vmem:[#allocation2 + $0xc4] ss:$8 sps:$4 sm:$0xff]   ;;  %v59_v17 = vpack.c.bf16 %v51_v15, %v43_v14  ;;  %v1832_v37 = vld [vmem:[#allocation2 + $0x2b4] ss:$8 sps:$4 sm:$0xff]   ;;  %v1937_v40 = vld [vmem:[%s2413_s3] ss:$8 sps:$4 sm:$0xff]  }
  0x30   :  { %850 = vmatpush1.bf16.msra.mxu1 %v1871_v51  ;;  %v1829_v31 = vld [vmem:[#allocation2 + $0x2a4] ss:$8 sps:$4 sm:$0xff]   ;;  %v1838_v46 = vld [vmem:[#allocation2 + $0x2d4] ss:$8 sps:$4 sm:$0xff]   ;;  %v1943_v47 = vld [vmem:[%s2413_s3 + $0x20] ss:$8 sps:$4 sm:$0xff]  }
  0x31   :  { %897 = vmatpush1.bf16.msra.mxu0 %v1772_v18  ;;  %851 = vmatprep.subr.bf16.mxu1 %v1875_v53  ;;  %v1815_v18 = vld [vmem:[#allocation2 + $0x260] ss:$8 sps:$4 sm:$0xff]   ;;  %v1939_v35 = vld [vmem:[%s2413_s3 + $0x4] ss:$8 sps:$4 sm:$0xff]   ;;  %v1948_v48 = vld [vmem:[%s2413_s3 + $0x34] ss:$8 sps:$4 sm:$0xff]  }
  0x32   :  { %898 = vmatprep.subr.bf16.mxu0 %v1773_v19  ;;  %v1820_v19 = vld [vmem:[#allocation2 + $0x274] ss:$8 sps:$4 sm:$0xff]   ;;  %871 = vmatprep.mubr.bf16.mxu1 %v59_v17  ;;  %v1945_v44 = vld [vmem:[%s2413_s3 + $0x24] ss:$8 sps:$4 sm:$0xff]   ;;  %v1946_v51 = vld [vmem:[%s2413_s3 + $0x30] ss:$8 sps:$4 sm:$0xff]  }
  0x33   :  { %v1844_v50 = vld [vmem:[#allocation2 + $0x2e4] ss:$8 sps:$4 sm:$0xff]   ;;  %v1842_v53 = vld [vmem:[#allocation2 + $0x2e0] ss:$8 sps:$4 sm:$0xff]   ;;  %v1966_v14 = vld [vmem:[%s2413_s3 + $0x94] ss:$8 sps:$4 sm:$0xff]  }
  0x34   :  { %852 = vmatpush1.bf16.msra.mxu1 %v1877_v57  ;;  %v1848_v57 = vld [vmem:[#allocation2 + $0x2f0] ss:$8 sps:$4 sm:$0xff]  }
  0x35   :  { %899 = vmatpush1.bf16.msra.mxu0 %v1775_v20  ;;  %853 = vmatprep.subr.bf16.mxu1 %v1881_v58  ;;  %v1913_v20 = vld [vmem:[#allocation2 + $0xc0] ss:$8 sps:$4 sm:$0xff]   ;;  %v1872_v15 = vld [vmem:[#allocation2 + $0x330] ss:$8 sps:$4 sm:$0xff]  }
  0x36   :  { %900 = vmatprep.subr.bf16.mxu0 %v1776_v21  ;;  %v1917_v21 = vld [vmem:[#allocation2 + $0xd4] ss:$8 sps:$4 sm:$0xff]   ;;  %v46_v58 = vld [vmem:[%s2410_s0 + $0x20] sm:$0xff]  ;;  %v1964_v17 = vld [vmem:[%s2413_s3 + $0x90] ss:$8 sps:$4 sm:$0xff]  }
  0x38   :  { %854 = vmatpush1.bf16.msra.mxu1 %v1883_v61  ;;  %v49_v61 = vld [vmem:[%s2410_s0 + $0x38] sm:$0xff] }
  0x39   :  { %901 = vmatpush1.bf16.msra.mxu0 %v1778_v22  ;;  %855 = vmatprep.subr.bf16.mxu1 %v1887_v62  ;;  %v1818_v22 = vld [vmem:[#allocation2 + $0x270] ss:$8 sps:$4 sm:$0xff]  }
  0x3a   :  { %902 = vmatprep.subr.bf16.mxu0 %v1779_v23  ;;  %v1823_v23 = vld [vmem:[#allocation2 + $0x284] ss:$8 sps:$4 sm:$0xff]   ;;  %v57_v62 = vld [vmem:[%s2410_s0 + $0x78] sm:$0xff] }
  0x3c   :  { %856 = vmatpush1.bf16.msra.mxu1 %v1889_v1  ;;  %v1957_v1 = vld [vmem:[%s2413_s3 + $0x64] ss:$8 sps:$4 sm:$0xff]  }
  0x3d   :  { %903 = vmatpush1.bf16.msra.mxu0 %v1781_v24  ;;  %857 = vmatprep.subr.bf16.mxu1 %v1893_v2  ;;  %v1919_v24 = vld [vmem:[#allocation2 + $0xd0] ss:$8 sps:$4 sm:$0xff]   ;;  %v1854_v2 = vld [vmem:[#allocation2 + $0x300] ss:$8 sps:$4 sm:$0xff]  }
  0x3e   :  { %904 = vmatprep.subr.bf16.mxu0 %v1782_v25  ;;  %v1923_v25 = vld [vmem:[#allocation2 + $0xe4] ss:$8 sps:$4 sm:$0xff]  }
  0x40   :  { %858 = vmatpush1.bf16.msra.mxu1 %v1895_v5  ;;  %v1955_v5 = vld [vmem:[%s2413_s3 + $0x60] ss:$8 sps:$4 sm:$0xff]  }
  0x41   :  { %905 = vmatpush1.bf16.msra.mxu0 %v1784_v28  ;;  %859 = vmatprep.subr.bf16.mxu1 %v1899_v6  ;;  %v1925_v28 = vld [vmem:[#allocation2 + $0xe0] ss:$8 sps:$4 sm:$0xff]   ;;  %v1960_v6 = vld [vmem:[%s2413_s3 + $0x74] ss:$8 sps:$4 sm:$0xff]  }
  0x42   :  { %906 = vmatprep.subr.bf16.mxu0 %v1785_v29  ;;  %v1824_v29 = vld [vmem:[#allocation2 + $0x290] ss:$8 sps:$4 sm:$0xff]  }
  0x44   :  { %860 = vmatpush1.bf16.msra.mxu1 %v1901_v9  ;;  %v1958_v9 = vld [vmem:[%s2413_s3 + $0x70] ss:$8 sps:$4 sm:$0xff]  }
  0x45   :  { %907 = vmatpush1.bf16.msra.mxu0 %v1787_v32  ;;  %861 = vmatprep.subr.bf16.mxu1 %v1905_v10  ;;  %v1931_v32 = vld [vmem:[#allocation2 + $0xf0] ss:$8 sps:$4 sm:$0xff]   ;;  %v1963_v10 = vld [vmem:[%s2413_s3 + $0x84] ss:$8 sps:$4 sm:$0xff]  }
  0x46   :  { %908 = vmatprep.subr.bf16.mxu0 %v1788_v34  ;;  %v50_v34 = vld [vmem:[%s2410_s0 + $0x40] sm:$0xff] }
  0x48   :  { %862 = vmatpush1.bf16.msra.mxu1 %v1907_v13  ;;  %v1961_v13 = vld [vmem:[%s2413_s3 + $0x80] ss:$8 sps:$4 sm:$0xff]  }
  0x49   :  { %909 = vmatpush1.bf16.msra.mxu0 %v1790_v36  ;;  %863 = vmatprep.subr.bf16.mxu1 %v1911_v16  ;;  %v1827_v36 = vld [vmem:[#allocation2 + $0x2a0] ss:$8 sps:$4 sm:$0xff]   ;;  %v1880_v16 = vld [vmem:[#allocation2 + $0x344] ss:$8 sps:$4 sm:$0xff]  }
  0x4a   :  { %910 = vmatprep.subr.bf16.mxu0 %v1791_v38  ;;  %v58_v38 = vpack.c.bf16 %v50_v34, %v42_v33  ;;  %v1910_v33 = vld [vmem:[#allocation2 + $0x394] ss:$8 sps:$4 sm:$0xff]   ;;  %v1908_v34 = vld [vmem:[#allocation2 + $0x390] ss:$8 sps:$4 sm:$0xff]  }
  0x4c   :  { %864 = vmatpush1.bf16.msra.mxu1 %v1913_v20  ;;  %v1886_v20 = vld [vmem:[#allocation2 + $0x354] ss:$8 sps:$4 sm:$0xff]  }
  0x4d   :  { %911 = vmatpush1.bf16.msra.mxu0 %v1793_v41  ;;  %865 = vmatprep.subr.bf16.mxu1 %v1917_v21  ;;  %v1942_v41 = vld [vmem:[%s2413_s3 + $0x14] ss:$8 sps:$4 sm:$0xff]   ;;  %v1967_v21 = vld [vmem:[%s2413_s3 + $0xa0] ss:$8 sps:$4 sm:$0xff]  }
  0x4e   :  { %912 = vmatprep.subr.bf16.mxu0 %v1794_v42  ;;  %v1835_v42 = vld [vmem:[#allocation2 + $0x2c4] ss:$8 sps:$4 sm:$0xff]  }
  0x50   :  { %866 = vmatpush1.bf16.msra.mxu1 %v1919_v24  ;;  %v1892_v24 = vld [vmem:[#allocation2 + $0x364] ss:$8 sps:$4 sm:$0xff]  }
  0x51   :  { %913 = vmatpush1.bf16.msra.mxu0 %v1796_v43  ;;  %867 = vmatprep.subr.bf16.mxu1 %v1923_v25  ;;  %v1940_v43 = vld [vmem:[%s2413_s3 + $0x10] ss:$8 sps:$4 sm:$0xff]  }
  0x52   :  { %925 = vmatprep.subr.bf16.mxu0 %v1799_v45  ;;  %v1833_v45 = vld [vmem:[#allocation2 + $0x2c0] ss:$8 sps:$4 sm:$0xff]   ;;  %v1970_v25 = vld [vmem:[%s2413_s3 + $0xb0] ss:$8 sps:$4 sm:$0xff]  }
  0x54   :  { %915 = vmatmul.mubr.bf16.vlgmr.msra.gmra.mrb[0].mxu0 %v60_v52  ;;  %868 = vmatpush1.bf16.msra.mxu1 %v1925_v28  ;;  %v1951_v52 = vld [vmem:[%s2413_s3 + $0x44] ss:$8 sps:$4 sm:$0xff]   ;;  %v1898_v28 = vld [vmem:[#allocation2 + $0x374] ss:$8 sps:$4 sm:$0xff]  }
  0x55   :  { %926 = vmatpush1.bf16.msra.mxu0 %v1797_v54  ;;  %957 = vmatprep.mubr.bf16.mxu0 %v63_v55  ;;  %v1850_v54 = vld [vmem:[#allocation2 + $0x2f4] ss:$8 sps:$4 sm:$0xff]   ;;  %v1949_v55 = vld [vmem:[%s2413_s3 + $0x40] ss:$8 sps:$4 sm:$0xff]  }
  0x56   :  { %927 = vmatprep.subr.bf16.mxu0 %v1802_v56  ;;  %869 = vmatprep.subr.bf16.mxu1 %v1929_v30  ;;  %v1954_v56 = vld [vmem:[%s2413_s3 + $0x54] ss:$8 sps:$4 sm:$0xff]   ;;  %v1896_v30 = vld [vmem:[#allocation2 + $0x370] ss:$8 sps:$4 sm:$0xff]  }
  0x58   :  { %870 = vmatpush1.bf16.msra.mxu1 %v1931_v32  ;;  %v1902_v32 = vld [vmem:[#allocation2 + $0x380] ss:$8 sps:$4 sm:$0xff]  }
  0x59   :  { %928 = vmatpush1.bf16.msra.mxu0 %v1800_v59  ;;  %1217 = vmatprep.subr.bf16.mxu1 %v1939_v35  ;;  %v54_v59 = vld [vmem:[%s2410_s0 + $0x60] sm:$0xff] }
  0x5a   :  { %929 = vmatprep.subr.bf16.mxu0 %v1805_v60  ;;  %v1856_v60 = vld [vmem:[#allocation2 + $0x304] ss:$8 sps:$4 sm:$0xff]  }
  0x5b   :  { %872 = vmatmul.mubr.bf16.vlgmr.msra.gmra.mrb[0].mxu1 %v58_v38  ;;  %v1916_v35 = vld [vmem:[#allocation2 + $0x3a4] ss:$8 sps:$4 sm:$0xff]   ;;  %v1920_v38 = vld [vmem:[#allocation2 + $0x3b0] ss:$8 sps:$4 sm:$0xff]  }
  0x5c   :  { %1218 = vmatpush1.bf16.msra.mxu1 %v1937_v40  ;;  %v1926_v40 = vld [vmem:[#allocation2 + $0x3c0] ss:$8 sps:$4 sm:$0xff]  }
  0x5d   :  { %930 = vmatpush1.bf16.msra.mxu0 %v1803_v63  ;;  %1219 = vmatprep.subr.bf16.mxu1 %v1942_v41  ;;  %v1952_v63 = vld [vmem:[%s2413_s3 + $0x50] ss:$8 sps:$4 sm:$0xff]   ;;  %v1934_v41 = vld [vmem:[#allocation2 + $0x3d4] ss:$8 sps:$4 sm:$0xff]  }
  0x5e   :  { %931 = vmatprep.subr.bf16.mxu0 %v1808_v0  ;;  %v62_v0 = vpack.c.bf16 %v54_v59, %v46_v58 }
  0x60   :  { %1220 = vmatpush1.bf16.msra.mxu1 %v1940_v43  ;;  %v1932_v43 = vld [vmem:[#allocation2 + $0x3d0] ss:$8 sps:$4 sm:$0xff]  }
  0x61   :  { %932 = vmatpush1.bf16.msra.mxu0 %v1806_v3  ;;  %1221 = vmatprep.subr.bf16.mxu1 %v1945_v44  ;;  %v65_v3 = vpack.c.bf16 %v57_v62, %v49_v61  ;;  %v193_v61 = vlaneseq }
  0x62   :  { %933 = vmatprep.subr.bf16.mxu0 %v1811_v4  ;;  %v1862_v4 = vld [vmem:[#allocation2 + $0x314] ss:$8 sps:$4 sm:$0xff]  }
  0x63   :  { %v194_v62 = vshrl.u32 %v193_v61, 7 }
  0x64   :  { %1222 = vmatpush1.bf16.msra.mxu1 %v1943_v47  ;;  %v56_v47 = vld [vmem:[%s2410_s0 + $0x70] sm:$0xff] }
  0x65   :  { %934 = vmatpush1.bf16.msra.mxu0 %v1809_v7  ;;  %1223 = vmatprep.subr.bf16.mxu1 %v1948_v48  ;;  %v1860_v7 = vld [vmem:[#allocation2 + $0x310] ss:$8 sps:$4 sm:$0xff]  }
  0x66   :  { %935 = vmatprep.subr.bf16.mxu0 %v1814_v8  ;;  %v1868_v8 = vld [vmem:[#allocation2 + $0x324] ss:$8 sps:$4 sm:$0xff]  }
  0x68   :  { %1224 = vmatpush1.bf16.msra.mxu1 %v1946_v51  ;;  %v1978_v51 = vld [vmem:[%s2413_s3 + $0xd4] ss:$8 sps:$4 sm:$0xff]  }
  0x69   :  { %936 = vmatpush1.bf16.msra.mxu0 %v1812_v11  ;;  %1225 = vmatprep.subr.bf16.mxu1 %v1951_v52  ;;  %v1866_v11 = vld [vmem:[#allocation2 + $0x320] ss:$8 sps:$4 sm:$0xff]   ;;  %v1981_v52 = vld [vmem:[%s2413_s3 + $0xe4] ss:$8 sps:$4 sm:$0xff]  }
  0x6a   :  { %937 = vmatprep.subr.bf16.mxu0 %v1817_v12  ;;  %v1874_v12 = vld [vmem:[#allocation2 + $0x334] ss:$8 sps:$4 sm:$0xff]  }
  0x6c   :  { %1226 = vmatpush1.bf16.msra.mxu1 %v1949_v55  ;;  %v1982_v55 = vld [vmem:[%s2413_s3 + $0xf0] ss:$8 sps:$4 sm:$0xff]  }
  0x6d   :  { %938 = vmatpush1.bf16.msra.mxu0 %v1815_v18  ;;  %1227 = vmatprep.subr.bf16.mxu1 %v1954_v56  ;;  %v1969_v18 = vld [vmem:[%s2413_s3 + $0xa4] ss:$8 sps:$4 sm:$0xff]  }
  0x6e   :  { %939 = vmatprep.subr.bf16.mxu0 %v1820_v19  ;;  %v1878_v19 = vld [vmem:[#allocation2 + $0x340] ss:$8 sps:$4 sm:$0xff]   ;;  %v1987_v56 = vld [vmem:[%s2415_s5 + $0x4] ss:$8 sps:$4 sm:$0xff]  }
  0x70   :  { %1228 = vmatpush1.bf16.msra.mxu1 %v1952_v63  ;;  %v2286_v63 = vsub.s32 0, %v194_v62 }
  0x71   :  { %940 = vmatpush1.bf16.msra.mxu0 %v1818_v22  ;;  %1229 = vmatprep.subr.bf16.mxu1 %v1957_v1  ;;  %v1972_v22 = vld [vmem:[%s2413_s3 + $0xb4] ss:$8 sps:$4 sm:$0xff]   ;;  %v2291_v1 = vsub.s32 1, %v194_v62 }
  0x72   :  { %941 = vmatprep.subr.bf16.mxu0 %v1823_v23  ;;  %v1884_v23 = vld [vmem:[#allocation2 + $0x350] ss:$8 sps:$4 sm:$0xff]  }
  0x74   :  { %1230 = vmatpush1.bf16.msra.mxu1 %v1955_v5 }
  0x75   :  { %942 = vmatpush1.bf16.msra.mxu0 %v1821_v26  ;;  %1231 = vmatprep.subr.bf16.mxu1 %v1960_v6  ;;  %v1975_v26 = vld [vmem:[%s2413_s3 + $0xc4] ss:$8 sps:$4 sm:$0xff]  }
  0x76   :  { %943 = vmatprep.subr.bf16.mxu0 %v1826_v27  ;;  %v1890_v27 = vld [vmem:[#allocation2 + $0x360] ss:$8 sps:$4 sm:$0xff]  }
  0x78   :  { %1232 = vmatpush1.bf16.msra.mxu1 %v1958_v9 }
  0x79   :  { %944 = vmatpush1.bf16.msra.mxu0 %v1824_v29  ;;  %1233 = vmatprep.subr.bf16.mxu1 %v1963_v10  ;;  %v1973_v29 = vld [vmem:[%s2413_s3 + $0xc0] ss:$8 sps:$4 sm:$0xff]  }
  0x7a   :  { %945 = vmatprep.subr.bf16.mxu0 %v1829_v31  ;;  %v1904_v31 = vld [vmem:[#allocation2 + $0x384] ss:$8 sps:$4 sm:$0xff]  }
  0x7c   :  { %1234 = vmatpush1.bf16.msra.mxu1 %v1961_v13 }
  0x7d   :  { %946 = vmatpush1.bf16.msra.mxu0 %v1827_v36  ;;  %1235 = vmatprep.subr.bf16.mxu1 %v1966_v14  ;;  %v1914_v36 = vld [vmem:[#allocation2 + $0x3a0] ss:$8 sps:$4 sm:$0xff]  }
  0x7e   :  { %947 = vmatprep.subr.bf16.mxu0 %v1832_v37  ;;  %v1922_v37 = vld [vmem:[#allocation2 + $0x3b4] ss:$8 sps:$4 sm:$0xff]  }
  0x80   :  { %1236 = vmatpush1.bf16.msra.mxu1 %v1964_v17 }
  0x81   :  { %948 = vmatpush1.bf16.msra.mxu0 %v1830_v39  ;;  %1237 = vmatprep.subr.bf16.mxu1 %v1969_v18  ;;  %v1928_v39 = vld [vmem:[#allocation2 + $0x3c4] ss:$8 sps:$4 sm:$0xff]   ;;  %v1985_v18 = vld [vmem:[%s2415_s5] ss:$8 sps:$4 sm:$0xff]  }
  0x82   :  { %949 = vmatprep.subr.bf16.mxu0 %v1835_v42  ;;  %v190_v42 = vld [vmem:[#allocation2 + $0x3e0] sm:$0xff] }
  0x83   :  { %v1660_v44 = vcombine.high %v190_v42, %v190_v42 }
  0x84   :  { %1238 = vmatpush1.bf16.msra.mxu1 %v1967_v21  ;;  %v1993_v21 = vld [vmem:[%s2415_s5 + $0x24] ss:$8 sps:$4 sm:$0xff]  }
  0x85   :  { %950 = vmatpush1.bf16.msra.mxu0 %v1833_v45  ;;  %1239 = vmatprep.subr.bf16.mxu1 %v1972_v22  ;;  %v1659_v45 = vcombine.low %v190_v42, %v190_v42  ;;  %v1991_v22 = vld [vmem:[%s2415_s5 + $0x20] ss:$8 sps:$4 sm:$0xff]  }
  0x86   :  { %951 = vmatprep.subr.bf16.mxu0 %v1838_v46  ;;  %v48_v46 = vld [vmem:[%s2410_s0 + $0x30] sm:$0xff]  ;;  %v2021_v42 = vld [vmem:[%s2415_s5 + $0xc0] ss:$8 sps:$4 sm:$0xff]  }
  0x87   :  { %v834_v48 = vsel %vm832_vm1, %v1659_v45, 0  ;;  %v2029_v45 = vld [vmem:[%s2415_s5 + $0xe4] ss:$8 sps:$4 sm:$0xff]  }
  0x88   :  { %1240 = vmatpush1.bf16.msra.mxu1 %v1970_v25  ;;  %v1999_v25 = vld [vmem:[%s2415_s5 + $0x44] ss:$8 sps:$4 sm:$0xff]  }
  0x89   :  { %952 = vmatpush1.bf16.msra.mxu0 %v1836_v49  ;;  %1241 = vmatprep.subr.bf16.mxu1 %v1975_v26  ;;  %v64_v49 = vpack.c.bf16 %v56_v47, %v48_v46  ;;  %v1997_v26 = vld [vmem:[%s2415_s5 + $0x40] ss:$8 sps:$4 sm:$0xff]   ;;  %v2032_v47 = vld [vmem:[%s2415_s5 + $0xf4] ss:$8 sps:$4 sm:$0xff]  }
  0x8a   :  { %953 = vmatprep.subr.bf16.mxu0 %v1844_v50  ;;  %v1976_v50 = vld [vmem:[%s2413_s3 + $0xd0] ss:$8 sps:$4 sm:$0xff]   ;;  %v2027_v46 = vld [vmem:[%s2415_s5 + $0xe0] ss:$8 sps:$4 sm:$0xff]  }
  0x8c   :  { %1242 = vmatpush1.bf16.msra.mxu1 %v1973_v29  ;;  %v2005_v29 = vld [vmem:[%s2415_s5 + $0x64] ss:$8 sps:$4 sm:$0xff]  }
  0x8d   :  { %954 = vmatpush1.bf16.msra.mxu0 %v1842_v53  ;;  %1243 = vmatprep.subr.bf16.mxu1 %v1978_v51  ;;  %v1979_v53 = vld [vmem:[%s2413_s3 + $0xe0] ss:$8 sps:$4 sm:$0xff]  }
  0x8e   :  { %955 = vmatprep.subr.bf16.mxu0 %v1850_v54  ;;  %v1984_v54 = vld [vmem:[%s2413_s3 + $0xf4] ss:$8 sps:$4 sm:$0xff]  }
  0x90   :  { %1244 = vmatpush1.bf16.msra.mxu1 %v1976_v50 }
  0x91   :  { %956 = vmatpush1.bf16.msra.mxu0 %v1848_v57  ;;  %1245 = vmatprep.subr.bf16.mxu1 %v1981_v52 }
  0x92   :  { %968 = vmatprep.subr.bf16.mxu0 %v1856_v60 }
  0x94   :  { %958 = vmatmul.mubr.bf16.vlgmr.msra.gmra.mrb[0].mxu0 %v62_v0  ;;  %1246 = vmatpush1.bf16.msra.mxu1 %v1979_v53  ;;  %v191_v0 = vld [vmem:[%s2412_s2] sm:$0x3] }
  0x95   :  { %969 = vmatpush1.bf16.msra.mxu0 %v1854_v2  ;;  %1662 = vmatprep.mubr.msk.bf16.mxu0 %vm828_vm0, %v65_v3  ;;  %v196_v2 = vrot.slane %v191_v0, %v2286_v63  ;;  %v200_v3 = vrot.slane %v191_v0, %v2291_v1 }
  0x96   :  { %970 = vmatprep.subr.bf16.mxu0 %v1862_v4  ;;  %1247 = vmatprep.subr.bf16.mxu1 %v1984_v54 }
  0x98   :  { %1248 = vmatpush1.bf16.msra.mxu1 %v1982_v55 }
  0x99   :  { %971 = vmatpush1.bf16.msra.mxu0 %v1860_v7  ;;  %1470 = vmatprep.subr.bf16.mxu1 %v1987_v56 }
  0x9a   :  { %972 = vmatprep.subr.bf16.mxu0 %v1868_v8 }
  0x9d   :  { %973 = vmatpush1.bf16.msra.mxu0 %v1866_v11 }
  0x9e   :  { %974 = vmatprep.subr.bf16.mxu0 %v1874_v12 }
  0xa1   :  { %975 = vmatpush1.bf16.msra.mxu0 %v1872_v15 }
  0xa2   :  { %976 = vmatprep.subr.bf16.mxu0 %v1880_v16 }
  0xa5   :  { %977 = vmatpush1.bf16.msra.mxu0 %v1878_v19  ;;  %v1990_v19 = vld [vmem:[%s2415_s5 + $0x14] ss:$8 sps:$4 sm:$0xff]  }
  0xa6   :  { %978 = vmatprep.subr.bf16.mxu0 %v1886_v20  ;;  %v1988_v20 = vld [vmem:[%s2415_s5 + $0x10] ss:$8 sps:$4 sm:$0xff]  }
  0xa9   :  { %979 = vmatpush1.bf16.msra.mxu0 %v1884_v23  ;;  %v1996_v23 = vld [vmem:[%s2415_s5 + $0x34] ss:$8 sps:$4 sm:$0xff]  }
  0xaa   :  { %980 = vmatprep.subr.bf16.mxu0 %v1892_v24  ;;  %v1994_v24 = vld [vmem:[%s2415_s5 + $0x30] ss:$8 sps:$4 sm:$0xff]  }
  0xad   :  { %981 = vmatpush1.bf16.msra.mxu0 %v1890_v27  ;;  %v2002_v27 = vld [vmem:[%s2415_s5 + $0x54] ss:$8 sps:$4 sm:$0xff]  }
  0xae   :  { %982 = vmatprep.subr.bf16.mxu0 %v1898_v28  ;;  %v2000_v28 = vld [vmem:[%s2415_s5 + $0x50] ss:$8 sps:$4 sm:$0xff]  }
  0xb1   :  { %983 = vmatpush1.bf16.msra.mxu0 %v1896_v30  ;;  %v2003_v30 = vld [vmem:[%s2415_s5 + $0x60] ss:$8 sps:$4 sm:$0xff]  }
  0xb2   :  { %984 = vmatprep.subr.bf16.mxu0 %v1904_v31  ;;  %v2008_v31 = vld [vmem:[%s2415_s5 + $0x74] ss:$8 sps:$4 sm:$0xff]  }
  0xb5   :  { %985 = vmatpush1.bf16.msra.mxu0 %v1902_v32  ;;  %v2006_v32 = vld [vmem:[%s2415_s5 + $0x70] ss:$8 sps:$4 sm:$0xff]  }
  0xb6   :  { %986 = vmatprep.subr.bf16.mxu0 %v1910_v33  ;;  %v2011_v33 = vld [vmem:[%s2415_s5 + $0x84] ss:$8 sps:$4 sm:$0xff]  }
  0xb9   :  { %987 = vmatpush1.bf16.msra.mxu0 %v1908_v34  ;;  %v2009_v34 = vld [vmem:[%s2415_s5 + $0x80] ss:$8 sps:$4 sm:$0xff]  }
  0xba   :  { %988 = vmatprep.subr.bf16.mxu0 %v1916_v35  ;;  %v2014_v35 = vld [vmem:[%s2415_s5 + $0x94] ss:$8 sps:$4 sm:$0xff]  }
  0xbd   :  { %989 = vmatpush1.bf16.msra.mxu0 %v1914_v36  ;;  %v2012_v36 = vld [vmem:[%s2415_s5 + $0x90] ss:$8 sps:$4 sm:$0xff]  }
  0xbe   :  { %990 = vmatprep.subr.bf16.mxu0 %v1922_v37  ;;  %v2017_v37 = vld [vmem:[%s2415_s5 + $0xa4] ss:$8 sps:$4 sm:$0xff]  }
  0xc1   :  { %991 = vmatpush1.bf16.msra.mxu0 %v1920_v38  ;;  %v2015_v38 = vld [vmem:[%s2415_s5 + $0xa0] ss:$8 sps:$4 sm:$0xff]  }
  0xc2   :  { %992 = vmatprep.subr.bf16.mxu0 %v1928_v39  ;;  %v2020_v39 = vld [vmem:[%s2415_s5 + $0xb4] ss:$8 sps:$4 sm:$0xff]  }
  0xc5   :  { %993 = vmatpush1.bf16.msra.mxu0 %v1926_v40  ;;  %v2018_v40 = vld [vmem:[%s2415_s5 + $0xb0] ss:$8 sps:$4 sm:$0xff]  }
  0xc6   :  { %994 = vmatprep.subr.bf16.mxu0 %v1934_v41  ;;  %v2023_v41 = vld [vmem:[%s2415_s5 + $0xc4] ss:$8 sps:$4 sm:$0xff]  }
  0xc9   :  { %995 = vmatpush1.bf16.msra.mxu0 %v1932_v43  ;;  %v2026_v43 = vld [vmem:[%s2415_s5 + $0xd4] ss:$8 sps:$4 sm:$0xff]  }
  0xca   :  { %1661 = vmatprep.subr.msk.bf16.mxu0 %vm832_vm1, %v1660_v44  ;;  %v2024_v44 = vld [vmem:[%s2415_s5 + $0xd0] ss:$8 sps:$4 sm:$0xff]  }
  0xcd   :  { %997 = vmatpush1.bf16.msra.mxu0 %v834_v48  ;;  %v2030_v48 = vld [vmem:[%s2415_s5 + $0xf0] ss:$8 sps:$4 sm:$0xff]  }
  0xd0   :  { %1001 = vmatmul.mubr.bf16.vlgmr.msra.gmra.mrb[0].mxu0 %v64_v49  ;;  %v1045_v49 = vld [vmem:[%s2414_s4] sm:$0x3] }
  0xd1   :  { %v1050_v50 = vrot.slane %v1045_v49, %v2286_v63  ;;  %v1054_v51 = vrot.slane %v1045_v49, %v2291_v1 }
 0x12e   :  { %v873_v57 = vpop.f32.mrb[0].mxu1 }
 0x12f   :  { %v875_v58 = vpop.f32.mrb[1].mxu1  ;;  %v874_v4 = vadd.f32 %v873_v57, %v196_v2 }
 0x130   :  { %v877_v59 = vpop.f32.mrb[2].mxu1  ;;  %v876_v5 = vadd.f32 %v875_v58, %v200_v3 }
 0x131   :  { %v879_v60 = vpop.f32.mrb[3].mxu1  ;;  %v878_v7 = vadd.f32 %v877_v59, %v196_v2 }
 0x132   :  { %v880_v10 = vadd.f32 %v879_v60, %v200_v3 }
 0x1a3   :  { %v1002_v6 = vpop.f32.mrb[0].mxu0 }
 0x1a4   :  { %v1728_v8 = vadd.f32 %v1002_v6, %v874_v4  ;;  %v1004_v9 = vpop.f32.mrb[1].mxu0  ;;  %v1298_v4 = vld [vmem:[%s2416_s6] sm:$0x3]  ;;  %s2055_s6 = scalar_lea.vmem %s1524_s26, 512 }
 0x1a5   :  { %v1730_v11 = vadd.f32 %v1004_v9, %v876_v5  ;;  %v1006_v12 = vpop.f32.mrb[2].mxu0  ;;  %v1303_v5 = vrot.slane %v1298_v4, %v2286_v63  ;;  %v1307_v6 = vrot.slane %v1298_v4, %v2291_v1  ;;  %p2056_p8 = scmp.ne.s32.totalorder %s1524_s26, %s2055_s6  ;;  %p2061_p10 = scmp.lt.s32.totalorder %s2055_s6, %s2055_s6 }
 0x1a6   :  { %v1732_v13 = vadd.f32 %v1006_v12, %v878_v7  ;;  %v1008_v14 = vpop.f32.mrb[3].mxu0 }
 0x1a7   :  { %v1734_v15 = vadd.f32 %v1008_v14, %v880_v10  ;;  %p2062_p11 = por %p2061_p10, %p2060_p9 }
 0x1a8   :  { %v1011_v16 = vpack.c.bf16 %v1732_v13, %v1728_v8 }
 0x1a9   :  { %v1012_v17 = vpack.c.bf16 %v1734_v15, %v1730_v11  ;;  %p2063_p12 = pnand %p2062_p11, %p2056_p8 }
 0x1ab   :  { %1249 = vmatprep.mubr.bf16.mxu1 %v1012_v17 }
 0x1ac   :  { %1250 = vmatmul.mubr.bf16.vlgmr.msra.gmra.mrb[4].mxu1 %v1011_v16 }
 0x1ad   :  { %1471 = vmatpush1.bf16.msra.mxu1 %v1985_v18 }
 0x1ae   :  { %1472 = vmatprep.subr.bf16.mxu1 %v1990_v19 }
 0x1b1   :  { %1473 = vmatpush1.bf16.msra.mxu1 %v1988_v20 }
 0x1b2   :  { %1474 = vmatprep.subr.bf16.mxu1 %v1993_v21 }
 0x1b5   :  { %1475 = vmatpush1.bf16.msra.mxu1 %v1991_v22 }
 0x1b6   :  { %1476 = vmatprep.subr.bf16.mxu1 %v1996_v23 }
 0x1b9   :  { %1477 = vmatpush1.bf16.msra.mxu1 %v1994_v24 }
 0x1ba   :  { %1478 = vmatprep.subr.bf16.mxu1 %v1999_v25 }
 0x1bd   :  { %1479 = vmatpush1.bf16.msra.mxu1 %v1997_v26 }
 0x1be   :  { %1480 = vmatprep.subr.bf16.mxu1 %v2002_v27 }
 0x1c1   :  { %1481 = vmatpush1.bf16.msra.mxu1 %v2000_v28 }
 0x1c2   :  { %1482 = vmatprep.subr.bf16.mxu1 %v2005_v29 }
 0x1c5   :  { %1483 = vmatpush1.bf16.msra.mxu1 %v2003_v30 }
 0x1c6   :  { %1484 = vmatprep.subr.bf16.mxu1 %v2008_v31 }
 0x1c9   :  { %1485 = vmatpush1.bf16.msra.mxu1 %v2006_v32 }
 0x1ca   :  { %1486 = vmatprep.subr.bf16.mxu1 %v2011_v33 }
 0x1cd   :  { %1487 = vmatpush1.bf16.msra.mxu1 %v2009_v34 }
 0x1ce   :  { %1488 = vmatprep.subr.bf16.mxu1 %v2014_v35 }
 0x1d1   :  { %1489 = vmatpush1.bf16.msra.mxu1 %v2012_v36 }
 0x1d2   :  { %1490 = vmatprep.subr.bf16.mxu1 %v2017_v37 }
 0x1d5   :  { %1491 = vmatpush1.bf16.msra.mxu1 %v2015_v38 }
 0x1d6   :  { %1492 = vmatprep.subr.bf16.mxu1 %v2020_v39 }
 0x1d9   :  { %1493 = vmatpush1.bf16.msra.mxu1 %v2018_v40 }
 0x1da   :  { %1494 = vmatprep.subr.bf16.mxu1 %v2023_v41 }
 0x1dd   :  { %1495 = vmatpush1.bf16.msra.mxu1 %v2021_v42 }
 0x1de   :  { %1496 = vmatprep.subr.bf16.mxu1 %v2026_v43 }
 0x1e1   :  { %1497 = vmatpush1.bf16.msra.mxu1 %v2024_v44 }
 0x1e2   :  { %1498 = vmatprep.subr.bf16.mxu1 %v2029_v45 }
 0x1e5   :  { %1499 = vmatpush1.bf16.msra.mxu1 %v2027_v46 }
 0x1e6   :  { %1500 = vmatprep.subr.bf16.mxu1 %v2032_v47 }
 0x1e9   :  { %1501 = vmatpush1.bf16.msra.mxu1 %v2030_v48 }
 0x27f   :  { %v1251_v52 = vpop.f32.mrb[4].mxu1 }
 0x280   :  { %v1252_v53 = vadd.f32 %v1251_v52, %v1050_v50  ;;  %v1253_v54 = vpop.f32.mrb[5].mxu1 }
 0x281   :  { %v1254_v55 = vadd.f32 %v1253_v54, %v1054_v51  ;;  %v1255_v56 = vpop.f32.mrb[6].mxu1 }
 0x282   :  { %v1256_v57 = vadd.f32 %v1255_v56, %v1050_v50  ;;  %v1257_v58 = vpop.f32.mrb[7].mxu1  ;;  %v1260_v60 = vmax.f32 %v1252_v53, 0.0 }
 0x283   :  { %v1258_v59 = vadd.f32 %v1257_v58, %v1054_v51  ;;  %v1261_v62 = vmax.f32 %v1254_v55, 0.0 }
 0x284   :  { %v1262_v61 = vmax.f32 %v1256_v57, 0.0 }
 0x285   :  { %v1263_v0 = vmax.f32 %v1258_v59, 0.0 }
 0x286   :  { %v1264_v2 = vpack.c.bf16 %v1262_v61, %v1260_v60 }
 0x287   :  { %v1265_v3 = vpack.c.bf16 %v1263_v0, %v1261_v62 }
 0x289   :  { %1502 = vmatprep.mubr.bf16.mxu1 %v1265_v3 }
 0x28a   :  { %1503 = vmatmul.mubr.bf16.vlgmr.msra.gmra.mrb[8].mxu1 %v1264_v2 }
 0x35d   :  { %v1504_v7 = vpop.f32.mrb[8].mxu1 }
 0x35e   :  { %v1505_v8 = vadd.f32 %v1504_v7, %v1303_v5  ;;  %v1506_v9 = vpop.f32.mrb[9].mxu1 }
 0x35f   :  { %v1507_v10 = vadd.f32 %v1506_v9, %v1307_v6  ;;  %v1508_v11 = vpop.f32.mrb[10].mxu1 }
 0x360   :  { %1513 = vst [vmem:[#allocation5] sm:$0xff] %v1505_v8  ;;  %v1509_v12 = vadd.f32 %v1508_v11, %v1303_v5  ;;  %v1510_v13 = vpop.f32.mrb[11].mxu1 }
 0x361   :  { %1515 = vst.msk [vmem:[#allocation5 + $0x8] sm:$0xff] %vm1514_vm2, %v1507_v10  ;;  %v1511_v14 = vadd.f32 %v1510_v13, %v1307_v6 }
 0x362   :  { %1516 = vst [vmem:[#allocation5 + $0x10] sm:$0xff] %v1509_v12 }
 0x363   :  { %1517 = vst.msk [vmem:[#allocation5 + $0x18] sm:$0xff] %vm1514_vm2, %v1511_v14 }
 0x364   :  { %2066 = shalt.err (!%p2063_p12)
}
 0x365   :  { %s2067_s29 = scalar_lea.hbm %s2417_s7, 512 }
 0x366   :  { %p2068_p13 = scmp.ne.s32.totalorder %s2417_s7, %s2067_s29  ;;  %p2071_p0 = scmp.lt.u32.totalorder %s2067_s29, %s2417_s7 }
 0x368   :  { %p2073_p1 = pnand %p2071_p0, %p2068_p13 }
 0x36a   :  { %2076 = shalt.err (!%p2073_p1)
}
 0x36b   :  { %s2085_s10 = smov 256   ;;  %s2086_s11 = smov 16  }
 0x36c   :  { %1529 = dma.vmem_to_hbm [thread:$0]  %s1524_s26, 512, %s2417_s7, [#allocation4], %s2085_s10, %s2085_s10, %s2086_s11  }
 0x36d   :  { %2079 = dma.done.wait [#allocation4], 512  }
 0x36e   :  { %2080 = vsyncadd [#allocation4], 4294966784 }
 0x36f   :  { %1533 = vsyncpa [#allocation3], 1 }
 0x370   :  { %1534 = vsyncpa [#allocation4], 1 }

</bundles_post_ra>
